<compile_context>
chip_gen: v7x
topology: tpu7x:2x2x1
jax: 0.10.0
libtpu: 0.0.40
codegen_flags: <defaults>
</compile_context>

<pallas_src>
import functools

import jax
import jax.numpy as jnp
from jax.experimental import pallas as pl
from jax.experimental.pallas import tpu as pltpu


def _xw_kernel(x_ref, w_ref, out_ref):
    # Streamed GEMM tile: y = x @ W. Native-dtype MXU inputs, f32 accumulation,
    # result written back directly in the output dtype (no extra cast pass).
    out_ref[...] = jnp.dot(
        x_ref[...], w_ref[...], preferred_element_type=jnp.float32
    ).astype(out_ref.dtype)


def _cdiv(a, b):
    return -(-a // b)


def _round_up(n, m):
    return ((n + m - 1) // m) * m


def _vmem_budget_bytes():
    # Generation-aware scoped-VMEM budget (v5e/v6e: 128 MiB physical, v7x: 64 MiB).
    cap = 64 * 1024 * 1024
    try:
        cap = int(getattr(pltpu.get_tpu_info(), "vmem_capacity_bytes", cap))
    except Exception:  # conservative fallback if the query is unavailable
        pass
    return int(min(int(cap * 0.6), 100 * 1024 * 1024))


def _choose_block_rows(nrows, ncols, x_itemsize, w_itemsize, budget_bytes, cap_rows):
    """Row-tile size: sublane-aligned, fits the VMEM budget (x/out double-buffered and
    W counted twice to cover its default double buffer), >=512 rows for HBM roofline,
    and ~8 grid steps so DMA/compute overlap and both v7x TensorCores get work."""
    if nrows <= 8:
        return int(nrows)                      # block == full dim: always legal
    w_bytes = 2 * ncols * ncols * w_itemsize
    per_row = 4 * ncols * x_itemsize           # (x + out) x 2 pipeline buffers
    avail = max(budget_bytes - w_bytes, 8 * per_row)
    vmem_rows = max(8, (avail // per_row) // 8 * 8)
    tb = max(512, _round_up(_cdiv(nrows, 8), 8))        # aim for ~8 grid steps
    tb = min(tb, cap_rows, vmem_rows, max(8, (nrows // 8) * 8))
    return int(tb)


@functools.partial(jax.jit, static_argnames=("mode", "block_rows", "xla_fallback_rows"))
def lu_invertible_mm(x, L, U, P, sign_S, log_S, *, mode="direct",
                     block_rows=4096, xla_fallback_rows=1024):
    """LUInvertibleMM forward: (x @ W, sum(log_S) per row) for mode='direct',
    (x @ W^-1, -sum(log_S) per row) otherwise."""
    B, D = x.shape
    f32 = jnp.float32

    # ---- Parameter-only W build (tiny DxD; fused by XLA, hoisted out of the kernel).
    Lm = jnp.tril(L.astype(f32), -1) + jnp.eye(D, dtype=f32)
    Um = jnp.triu(U.astype(f32), 1) + jnp.diag(
        sign_S.astype(f32) * jnp.exp(log_S.astype(f32)))
    W = P.astype(f32) @ Lm @ Um
    logdet_scalar = jnp.sum(log_S.astype(f32))
    if mode != "direct":
        W = jnp.linalg.inv(W)              # parameter-only; no Pallas needed
        logdet_scalar = -logdet_scalar
    logdet = jnp.full((B, 1), logdet_scalar, dtype=f32)

    # ---- Tiny-problem fast path: pallas_call/DMA setup overhead dominates there.
    if B <= xla_fallback_rows:
        y = jnp.dot(x, W.astype(x.dtype),
                    preferred_element_type=f32).astype(x.dtype)
        return y, logdet

    # ---- Lane packing for narrow feature dims (D < 128): present full 128-lane rows
    # to the MXU and avoid masked vst on the output stream. Row-major reshape is free.
    g = 128 // D if (D < 128 and 128 % D == 0 and B % (128 // D) == 0) else 1
    x2 = x.reshape(B // g, g * D) if g > 1 else x
    Wk = (jnp.kron(jnp.eye(g, dtype=f32), W) if g > 1 else W).astype(x.dtype)
    nrows, ncols = x2.shape

    budget = _vmem_budget_bytes()
    tb = _choose_block_rows(nrows, ncols, x.dtype.itemsize, Wk.dtype.itemsize,
                            budget, block_rows)

    y2 = pl.pallas_call(
        _xw_kernel,
        out_shape=jax.ShapeDtypeStruct((nrows, ncols), x.dtype),
        grid=(_cdiv(nrows, tb),),                 # ragged last block masked by Pallas
        in_specs=[
            pl.BlockSpec((tb, ncols), lambda i: (i, 0)),      # x: streamed over rows
            pl.BlockSpec((ncols, ncols), lambda i: (0, 0)),   # W: resident across steps
        ],
        out_specs=pl.BlockSpec((tb, ncols), lambda i: (i, 0)),
        compiler_params=pltpu.CompilerParams(
            dimension_semantics=("parallel",),    # shard row stream across TCs (v7x)
            vmem_limit_bytes=int(budget),
        ),
    )(x2, Wk)

    y = y2.reshape(B, D) if g > 1 else y2
    return y, logdet


def _init_params(num_inputs, key):
    """Deterministic init mirroring the module's __init__:
    orthogonal W -> LU decomposition -> (P, L, U, sign_S, log_S)."""
    a = jax.random.normal(key, (num_inputs, num_inputs), dtype=jnp.float32)
    w_orth, _ = jnp.linalg.qr(a)                 # orthogonal init
    P, L, U = jax.scipy.linalg.lu(w_orth)        # w_orth = P @ L @ U
    S = jnp.diag(U)
    return P, L, U, jnp.sign(S), jnp.log(jnp.abs(S))


def _reference(x, L, U, P, sign_S, log_S):
    D = L.shape[0]
    Lm = jnp.tril(L, -1) + jnp.eye(D, dtype=jnp.float32)
    Um = jnp.triu(U, 1) + jnp.diag(sign_S * jnp.exp(log_S))
    W = P @ Lm @ Um
    y = x @ W
    logdet = jnp.full((x.shape[0], 1), jnp.sum(log_S), dtype=jnp.float32)
    return y, logdet


if __name__ == "__main__":
    key = jax.random.PRNGKey(0)
    k_param, k_x1, k_x2, k_p2 = jax.random.split(key, 4)

    # Case 1: narrow features (D=32 < 128) -> lane-packed Pallas path (g=4, 128 lanes).
    D1, B1 = 32, 256
    P1, L1, U1, s1, ls1 = _init_params(D1, k_param)
    x1 = jax.random.normal(k_x1, (B1, D1), dtype=jnp.float32)
    y1, ld1 = lu_invertible_mm(x1, L1, U1, P1, s1, ls1, xla_fallback_rows=0)
    y1 = jax.block_until_ready(y1)
    ld1 = jax.block_until_ready(ld1)
    y1_ref, ld1_ref = _reference(x1, L1, U1, P1, s1, ls1)
    assert y1.shape == (B1, D1) and ld1.shape == (B1, 1)
    assert jnp.allclose(y1, y1_ref, atol=1e-4, rtol=1e-4)
    assert jnp.allclose(ld1, ld1_ref, atol=1e-5, rtol=1e-5)

    # Case 2: non-packable feature dim (D=96) with ragged row count -> generic path,
    # exercises the cdiv grid + masked ragged last block (no jnp.pad round trip).
    D2, B2 = 96, 200
    P2, L2, U2, s2, ls2 = _init_params(D2, k_p2)
    x2 = jax.random.normal(k_x2, (B2, D2), dtype=jnp.float32)
    y2, ld2 = lu_invertible_mm(x2, L2, U2, P2, s2, ls2, xla_fallback_rows=0)
    y2 = jax.block_until_ready(y2)
    y2_ref, ld2_ref = _reference(x2, L2, U2, P2, s2, ls2)
    assert jnp.allclose(y2, y2_ref, atol=1e-4, rtol=1e-4)
    assert jnp.allclose(ld2, ld2_ref, atol=1e-5, rtol=1e-5)

    # Case 3: tiny batch -> XLA fast path (fixed pallas_call overhead would dominate).
    x3 = jax.random.normal(k_x1, (8, D1), dtype=jnp.float32)
    y3, ld3 = lu_invertible_mm(x3, L1, U1, P1, s1, ls1)
    y3 = jax.block_until_ready(y3)
    y3_ref, _ = _reference(x3, L1, U1, P1, s1, ls1)
    assert jnp.allclose(y3, y3_ref, atol=1e-4, rtol=1e-4)

    print("KERNEL_OK")
</pallas_src>

<mosaic_0001>
module attributes {stable_mosaic.version = 11 : i64} {
  func.func @_xw_kernel(%arg0: i32, %arg1: memref<64x128xf32, #tpu.memory_space<vmem>>, %arg2: memref<128x128xf32, #tpu.memory_space<vmem>>, %arg3: memref<64x128xf32, #tpu.memory_space<vmem>>) attributes {dimension_semantics = [#tpu.dimension_semantics<parallel>], iteration_bounds = array<i64: 1>, scalar_prefetch = 0 : i64, scratch_operands = 0 : i64, tpu.core_type = #tpu.core_type<tc>, window_params = [{transform_indices = @transform_0, window_bounds = array<i64: 64, 128>}, {pipeline_mode = #tpu.pipeline_mode<synchronous>, transform_indices = @transform_1, window_bounds = array<i64: 128, 128>}, {transform_indices = @transform_2, window_bounds = array<i64: 64, 128>}]} {
    %c0 = arith.constant 0 : index
    %c0_0 = arith.constant 0 : index
    %0 = vector.load %arg1[%c0, %c0_0] : memref<64x128xf32, #tpu.memory_space<vmem>>, vector<64x128xf32>
    %c0_1 = arith.constant 0 : index
    %c0_2 = arith.constant 0 : index
    %1 = vector.load %arg2[%c0_1, %c0_2] : memref<128x128xf32, #tpu.memory_space<vmem>>, vector<128x128xf32>
    %cst = arith.constant dense<0.000000e+00> : vector<64x128xf32>
    %2 = tpu.matmul %0, %1, %cst {dimension_numbers = #tpu.dot_dimension_numbers<[1], [0], [0], [1], [0, 0, 1, 1], [], []>} : vector<64x128xf32>, vector<128x128xf32>, vector<64x128xf32> -> vector<64x128xf32>
    %c0_3 = arith.constant 0 : index
    %c0_4 = arith.constant 0 : index
    %3 = vector.load %arg3[%c0_3, %c0_4] : memref<64x128xf32, #tpu.memory_space<vmem>>, vector<64x128xf32>
    tpu.vector_store %arg3[%c0_3, %c0_4], %2 {strides = array<i32>} : memref<64x128xf32, #tpu.memory_space<vmem>>, vector<64x128xf32>,
    return
  }
  func.func @transform_0(%arg0: i32) -> (i32, i32) {
    %c0_i32 = arith.constant 0 : i32
    %c0_i32_0 = arith.constant 0 : i32
    return %arg0, %c0_i32 : i32, i32
  }
  func.func @transform_1(%arg0: i32) -> (i32, i32) {
    %c0_i32 = arith.constant 0 : i32
    %c0_i32_0 = arith.constant 0 : i32
    %c0_i32_1 = arith.constant 0 : i32
    return %c0_i32, %c0_i32_0 : i32, i32
  }
  func.func @transform_2(%arg0: i32) -> (i32, i32) {
    %c0_i32 = arith.constant 0 : i32
    %c0_i32_0 = arith.constant 0 : i32
    return %arg0, %c0_i32 : i32, i32
  }
}

</mosaic_0001>

<bundles_post_ra>
// kernel: lu_invertible_mm.1
= control target key start
LH: loop header
LB: loop body
LE: loop exit
PB: predicated region body
PF: predicated region fallthrough
CT: control target
= control target key end

     0   :  { %s379_s1 = inlined_call_operand.vmem [shape: f32[128,128], index: 1, kind: input, shape index: {}]   ;;  %s380_s0 = inlined_call_operand.vmem [shape: f32[64,128], index: 0, kind: input, shape index: {}]   ;;  %s381_s2 = inlined_call_operand.vmem [shape: f32[64,128], index: 2, kind: output, shape index: {}]  }
   0x1   :  { %v19_v0 = vld [vmem:[%s379_s1] sm:$0xff]  ;;  %v20_v1 = vld [vmem:[%s379_s1 + $0x8] sm:$0xff]  ;;  %v21_v2 = vld [vmem:[%s379_s1 + $0x10] sm:$0xff] }
   0x2   :  { %v220_v3 = vpack.c.bf16 %v20_v1, %v19_v0  ;;  %v22_v4 = vld [vmem:[%s379_s1 + $0x18] sm:$0xff]  ;;  %v23_v6 = vld [vmem:[%s379_s1 + $0x20] sm:$0xff]  ;;  %v24_v7 = vld [vmem:[%s379_s1 + $0x28] sm:$0xff] }
   0x3   :  { %v224_v5 = vpack.c.bf16 %v22_v4, %v21_v2  ;;  %v228_v8 = vpack.c.bf16 %v24_v7, %v23_v6  ;;  %v11_v9 = vld [vmem:[%s380_s0] sm:$0xff]  ;;  %v25_v11 = vld [vmem:[%s379_s1 + $0x30] sm:$0xff]  ;;  %v26_v12 = vld [vmem:[%s379_s1 + $0x38] sm:$0xff] }
   0x4   :  { %221 = vmatprep.subr.bf16.mxu0 %v220_v3  ;;  %252 = vmatprep.subr.bf16.mxu1 %v220_v3  ;;  %v15_v10 = vld [vmem:[%s380_s0 + $0x20] sm:$0xff]  ;;  %v232_v13 = vpack.c.bf16 %v26_v12, %v25_v11  ;;  %v28_v15 = vld [vmem:[%s379_s1 + $0x48] sm:$0xff]  ;;  %v29_v17 = vld [vmem:[%s379_s1 + $0x50] sm:$0xff] }
   0x5   :  { %223 = vmatpush3.bf16.msra.mxu0 %v220_v3  ;;  %260 = vmatpush3.bf16.msra.mxu1 %v220_v3  ;;  %v27_v14 = vld [vmem:[%s379_s1 + $0x40] sm:$0xff]  ;;  %v30_v18 = vld [vmem:[%s379_s1 + $0x58] sm:$0xff]  ;;  %v32_v21 = vld [vmem:[%s379_s1 + $0x68] sm:$0xff] }
   0x6   :  { %225 = vmatprep.subr.bf16.mxu0 %v224_v5  ;;  %253 = vmatprep.subr.bf16.mxu1 %v224_v5  ;;  %v236_v16 = vpack.c.bf16 %v28_v15, %v27_v14  ;;  %v240_v19 = vpack.c.bf16 %v30_v18, %v29_v17  ;;  %v31_v20 = vld [vmem:[%s379_s1 + $0x60] sm:$0xff]  ;;  %v33_v23 = vld [vmem:[%s379_s1 + $0x70] sm:$0xff]  ;;  %v34_v24 = vld [vmem:[%s379_s1 + $0x78] sm:$0xff] }
   0x7   :  { %208 = vmatprep.mubr.f32.mxu0 %v11_v9  ;;  %214 = vmatprep.mubr.f32.mxu1 %v15_v10  ;;  %v244_v22 = vpack.c.bf16 %v32_v21, %v31_v20  ;;  %v248_v25 = vpack.c.bf16 %v34_v24, %v33_v23  ;;  %v12_v26 = vld [vmem:[%s380_s0 + $0x8] sm:$0xff]  ;;  %v13_v28 = vld [vmem:[%s380_s0 + $0x10] sm:$0xff]  ;;  %v14_v30 = vld [vmem:[%s380_s0 + $0x18] sm:$0xff] }
   0x8   :  { %v16_v27 = vld [vmem:[%s380_s0 + $0x28] sm:$0xff]  ;;  %v17_v29 = vld [vmem:[%s380_s0 + $0x30] sm:$0xff]  ;;  %v18_v31 = vld [vmem:[%s380_s0 + $0x38] sm:$0xff] }
   0x9   :  { %227 = vmatpush3.bf16.msra.mxu0 %v224_v5  ;;  %261 = vmatpush3.bf16.msra.mxu1 %v224_v5 }
   0xa   :  { %229 = vmatprep.subr.bf16.mxu0 %v228_v8  ;;  %254 = vmatprep.subr.bf16.mxu1 %v228_v8 }
   0xd   :  { %231 = vmatpush3.bf16.msra.mxu0 %v228_v8  ;;  %262 = vmatpush3.bf16.msra.mxu1 %v228_v8 }
   0xe   :  { %233 = vmatprep.subr.bf16.mxu0 %v232_v13  ;;  %255 = vmatprep.subr.bf16.mxu1 %v232_v13 }
  0x11   :  { %235 = vmatpush3.bf16.msra.mxu0 %v232_v13  ;;  %263 = vmatpush3.bf16.msra.mxu1 %v232_v13 }
  0x12   :  { %237 = vmatprep.subr.bf16.mxu0 %v236_v16  ;;  %256 = vmatprep.subr.bf16.mxu1 %v236_v16 }
  0x15   :  { %239 = vmatpush3.bf16.msra.mxu0 %v236_v16  ;;  %264 = vmatpush3.bf16.msra.mxu1 %v236_v16 }
  0x16   :  { %241 = vmatprep.subr.bf16.mxu0 %v240_v19  ;;  %257 = vmatprep.subr.bf16.mxu1 %v240_v19 }
  0x19   :  { %243 = vmatpush3.bf16.msra.mxu0 %v240_v19  ;;  %265 = vmatpush3.bf16.msra.mxu1 %v240_v19 }
  0x1a   :  { %245 = vmatprep.subr.bf16.mxu0 %v244_v22  ;;  %258 = vmatprep.subr.bf16.mxu1 %v244_v22 }
  0x1d   :  { %247 = vmatpush3.bf16.msra.mxu0 %v244_v22  ;;  %266 = vmatpush3.bf16.msra.mxu1 %v244_v22 }
  0x1e   :  { %249 = vmatprep.subr.bf16.mxu0 %v248_v25  ;;  %259 = vmatprep.subr.bf16.mxu1 %v248_v25 }
  0x21   :  { %251 = vmatpush3.bf16.msra.mxu0 %v248_v25  ;;  %267 = vmatpush3.bf16.msra.mxu1 %v248_v25 }
  0x24   :  { %209 = vmatmul.mubr.f32.vlgmr.msra.gmra.mrb[0].mxu0 %v12_v26  ;;  %215 = vmatmul.mubr.f32.vlgmr.msra.gmra.mrb[0].mxu1 %v16_v27 }
  0x25   :  { %211 = vmatprep.mubr.f32.mxu0 %v13_v28  ;;  %217 = vmatprep.mubr.f32.mxu1 %v17_v29 }
  0x28   :  { %212 = vmatmul.mubr.f32.gmra.mrb[2].mxu0 %v14_v30  ;;  %218 = vmatmul.mubr.f32.gmra.mrb[2].mxu1 %v18_v31 }
  0xf7   :  { %v210_v32 = vpop.f32.mrb[0].mxu0  ;;  %v216_v33 = vpop.f32.mrb[0].mxu1 }
  0xf8   :  { %141 = vst [vmem:[%s381_s2 + $0x8] sm:$0xff] %v210_v32  ;;  %145 = vst [vmem:[%s381_s2 + $0x28] sm:$0xff] %v216_v33  ;;  %v101_v34 = vpop.f32.mrb[1].mxu0  ;;  %v121_v35 = vpop.f32.mrb[1].mxu1 }
  0xf9   :  { %140 = vst [vmem:[%s381_s2] sm:$0xff] %v101_v34  ;;  %144 = vst [vmem:[%s381_s2 + $0x20] sm:$0xff] %v121_v35 }
  0xfb   :  { %v213_v36 = vpop.f32.mrb[2].mxu0  ;;  %v219_v37 = vpop.f32.mrb[2].mxu1 }
  0xfc   :  { %143 = vst [vmem:[%s381_s2 + $0x18] sm:$0xff] %v213_v36  ;;  %147 = vst [vmem:[%s381_s2 + $0x38] sm:$0xff] %v219_v37  ;;  %v111_v38 = vpop.f32.mrb[3].mxu0  ;;  %v131_v39 = vpop.f32.mrb[3].mxu1 }
  0xfd   :  { %142 = vst [vmem:[%s381_s2 + $0x10] sm:$0xff] %v111_v38  ;;  %146 = vst [vmem:[%s381_s2 + $0x30] sm:$0xff] %v131_v39 }

</bundles_post_ra>
